<compile_context>
chip_gen: v7x
topology: tpu7x:2x2x1
jax: 0.10.0
libtpu: 0.0.40
codegen_flags: <defaults>
</compile_context>

<pallas_src>
import functools

import jax
import jax.numpy as jnp
from jax.experimental import pallas as pl
from jax.experimental.pallas import tpu as pltpu


# ----------------------------------------------------------------------------
# VMEM sizing helpers
# ----------------------------------------------------------------------------
_VMEM_BUDGET = 30 * 1024 * 1024      # target per-step working set (fits v7x 64 MiB/TC)
_VMEM_LIMIT_CAP = 48 * 1024 * 1024   # never request more scoped VMEM than this


def _round_up(x, m):
    return (x + m - 1) // m * m


def _pad_axis_to(x, size, axis):
    pad = size - x.shape[axis]
    if pad == 0:
        return x
    cfg = [(0, 0)] * x.ndim
    cfg[axis] = (0, pad)
    return jnp.pad(x, cfg)


def _mm_vmem_bytes(tm, kp, np_, has_res):
    a = 2 * tm * kp * 2           # A tile, bf16, double-buffered
    b = 2 * kp * np_ * 2          # weights, bf16 (constant index -> DMA'd once)
    t = 2 * np_ * 4               # bias row, f32
    r = 2 * tm * np_ * 4 if has_res else 0
    o = 2 * tm * np_ * 4          # f32 output tile, double-buffered
    return a + b + t + r + o


def _vmem_limit(need_bytes):
    # 2x headroom for compiler-internal scratch, capped below physical VMEM on v7x.
    return int(min(_VMEM_LIMIT_CAP, max(16 * 1024 * 1024, 2 * need_bytes)))


def _pick_tm(mp8, kp, np_, has_res):
    """Largest M tile in {512,256,128} that keeps the working set in budget."""
    tm = 128
    for cand in (512, 256, 128):
        if _mm_vmem_bytes(cand, kp, np_, has_res) <= _VMEM_BUDGET:
            tm = cand
            break
    return min(tm, mp8)   # mp8 is already a multiple of 8


# ----------------------------------------------------------------------------
# Pallas kernels
# ----------------------------------------------------------------------------
def _mm_kernel(a_ref, b_ref, t_ref, o_ref, *, relu):
    # y = relu((A @ B) + bias) — BN scale is pre-folded into B, f32 accumulate.
    y = jnp.dot(a_ref[...], b_ref[...], preferred_element_type=jnp.float32)
    y = y + t_ref[...]
    if relu:
        y = jnp.maximum(y, 0.0)
    o_ref[...] = y.astype(o_ref.dtype)


def _mm_res_kernel(a_ref, b_ref, t_ref, r_ref, o_ref, *, relu):
    # y = relu((A @ B) + bias + residual)
    y = jnp.dot(a_ref[...], b_ref[...], preferred_element_type=jnp.float32)
    y = y + t_ref[...] + r_ref[...]
    if relu:
        y = jnp.maximum(y, 0.0)
    o_ref[...] = y.astype(o_ref.dtype)


def _maxpool9_kernel(x_ref, o_ref):
    # x_ref: (9, TM, C) window elements; elementwise max over the 9 taps.
    m = x_ref[0]
    for k in range(1, 9):
        m = jnp.maximum(m, x_ref[k])
    o_ref[...] = m


def _avgpool_kernel(x_ref, o_ref, *, inv_hw):
    # x_ref: (1, HW, C) -> mean over spatial -> (1, C)
    o_ref[...] = jnp.sum(x_ref[0], axis=0, keepdims=True) * inv_hw


# ----------------------------------------------------------------------------
# Wrappers around pallas_call
# ----------------------------------------------------------------------------
def matmul_fused(a, b, bias, residual=None, relu=False):
    """out[M,N] = epilogue(a[M,K] @ b[K,N]); epilogue = + bias (+residual)(+ReLU).

    a/b are cast to bfloat16 for the MXU (bf16-native on v5e/v6e/v7x);
    accumulation and epilogue are float32.
    """
    M, K = a.shape
    N = b.shape[1]
    Kp = _round_up(K, 128)
    Np = _round_up(N, 128)
    Mp8 = _round_up(M, 8)

    has_res = residual is not None
    TM = _pick_tm(Mp8, Kp, Np, has_res)
    Mp = _round_up(Mp8, TM)          # always pad M up to the tile -> grid = Mp // TM

    a_p = _pad_axis_to(_pad_axis_to(a, Mp, 0), Kp, 1).astype(jnp.bfloat16)
    b_p = _pad_axis_to(_pad_axis_to(b, Kp, 0), Np, 1).astype(jnp.bfloat16)
    t_p = _pad_axis_to(bias.reshape(1, N).astype(jnp.float32), Np, 1)

    in_specs = [
        pl.BlockSpec((TM, Kp), lambda i: (i, 0)),
        # Constant index maps: Pallas only DMAs these blocks once across the grid.
        # (A single-resident buffer via pl.Buffered(1) would also reclaim the
        #  idle second buffer; not required at these tile sizes.)
        pl.BlockSpec((Kp, Np), lambda i: (0, 0)),
        pl.BlockSpec((1, Np), lambda i: (0, 0)),
    ]
    args = [a_p, b_p, t_p]
    if has_res:
        r_p = _pad_axis_to(_pad_axis_to(residual.astype(jnp.float32), Mp, 0), Np, 1)
        in_specs.append(pl.BlockSpec((TM, Np), lambda i: (i, 0)))
        args.append(r_p)
        kernel = functools.partial(_mm_res_kernel, relu=relu)
    else:
        kernel = functools.partial(_mm_kernel, relu=relu)

    need = _mm_vmem_bytes(TM, Kp, Np, has_res)
    out = pl.pallas_call(
        kernel,
        out_shape=jax.ShapeDtypeStruct((Mp, Np), jnp.float32),
        grid=(Mp // TM,),
        in_specs=in_specs,
        out_specs=pl.BlockSpec((TM, Np), lambda i: (i, 0)),
        compiler_params=pltpu.CompilerParams(
            dimension_semantics=("parallel",),
            vmem_limit_bytes=_vmem_limit(need),
        ),
    )(*args)
    return out[:M, :N]


def conv2d_bn_fused(x_nhwc, w_oihw, scale, bias, stride, padding,
                    relu=False, residual=None):
    """Conv2d (no bias) + folded BN (+ residual)(+ ReLU). x: NHWC, w: OIHW."""
    N, H, W, Cin = x_nhwc.shape
    Cout, _, KH, KW = w_oihw.shape
    OH = (H + 2 * padding - KH) // stride + 1
    OW = (W + 2 * padding - KW) // stride + 1

    xp = jnp.pad(x_nhwc, ((0, 0), (padding, padding), (padding, padding), (0, 0)))
    patches = [xp[:, kh:kh + stride * OH:stride, kw:kw + stride * OW:stride, :]
               for kh in range(KH) for kw in range(KW)]
    # TODO(synk): avoid materializing the KH*KW-inflated im2col matrix in HBM by
    # accumulating over taps inside the kernel (needs overlapping-window /
    # element-offset BlockSpecs); that is the remaining bandwidth saving at
    # real resolutions.
    pat = jnp.stack(patches, axis=3).reshape(N * OH * OW, KH * KW * Cin)

    # Fold the BN scale into the weight matrix columns (drops the per-element
    # scale multiply from the kernel epilogue); cast to bf16 happens after fold.
    bmat = jnp.transpose(w_oihw, (2, 3, 1, 0)).reshape(KH * KW * Cin, Cout)
    bmat = bmat * scale.reshape(1, Cout).astype(jnp.float32)

    res_flat = None
    if residual is not None:
        res_flat = residual.reshape(N * OH * OW, Cout)

    out = matmul_fused(pat, bmat, bias, residual=res_flat, relu=relu)
    return out.reshape(N, OH, OW, Cout)


def maxpool_3x3_s2_p1(x_nhwc):
    """nn.MaxPool2d(kernel_size=3, stride=2, padding=1), tiled over rows."""
    N, H, W, C = x_nhwc.shape
    OH = (H + 2 - 3) // 2 + 1
    OW = (W + 2 - 3) // 2 + 1
    xp = jnp.pad(x_nhwc, ((0, 0), (1, 1), (1, 1), (0, 0)),
                 constant_values=-jnp.inf)
    taps = [xp[:, kh:kh + 2 * OH:2, kw:kw + 2 * OW:2, :]
            for kh in range(3) for kw in range(3)]
    pat = jnp.stack(taps, axis=0).reshape(9, N * OH * OW, C)

    M = N * OH * OW
    TM = min(512, _round_up(M, 8))
    Mp = _round_up(M, TM)
    pat = _pad_axis_to(pat, Mp, axis=1)

    need = 2 * 9 * TM * C * 4 + 2 * TM * C * 4
    out = pl.pallas_call(
        _maxpool9_kernel,
        out_shape=jax.ShapeDtypeStruct((Mp, C), jnp.float32),
        grid=(Mp // TM,),
        in_specs=[pl.BlockSpec((9, TM, C), lambda i: (0, i, 0))],
        out_specs=pl.BlockSpec((TM, C), lambda i: (i, 0)),
        compiler_params=pltpu.CompilerParams(
            dimension_semantics=("parallel",),
            vmem_limit_bytes=_vmem_limit(need),
        ),
    )(pat)
    return out[:M].reshape(N, OH, OW, C)


def global_avgpool(x_nhwc):
    """nn.AdaptiveAvgPool2d((1,1)) followed by flatten -> (N, C)."""
    N, H, W, C = x_nhwc.shape
    hw = H * W
    xr = x_nhwc.reshape(N, hw, C)
    need = 2 * hw * C * 4 + 2 * C * 4
    out = pl.pallas_call(
        functools.partial(_avgpool_kernel, inv_hw=1.0 / hw),
        out_shape=jax.ShapeDtypeStruct((N, C), jnp.float32),
        grid=(N,),
        in_specs=[pl.BlockSpec((1, hw, C), lambda i: (i, 0, 0))],
        out_specs=pl.BlockSpec((1, C), lambda i: (i, 0)),
        compiler_params=pltpu.CompilerParams(
            dimension_semantics=("parallel",),
            vmem_limit_bytes=_vmem_limit(need),
        ),
    )(xr)
    return out


# ----------------------------------------------------------------------------
# Parameter init (deterministic, synthetic) and model forward
# ----------------------------------------------------------------------------
class ParamGen:
    def __init__(self, key):
        self.key = key
        self.count = 0

    def _next(self):
        self.count += 1
        return jax.random.fold_in(self.key, self.count)

    def normal(self, shape, std=0.05):
        return std * jax.random.normal(self._next(), shape, dtype=jnp.float32)

    def conv(self, cout, cin, k):
        return self.normal((cout, cin, k, k), std=0.1)

    def bn(self, c):
        return {
            "gamma": 1.0 + self.normal((c,), 0.1),
            "beta": self.normal((c,), 0.1),
            "mean": self.normal((c,), 0.1),
            "var": 1.0 + jnp.abs(self.normal((c,), 0.1)),
        }


def bn_fold(bn, eps=1e-5):
    scale = bn["gamma"] / jnp.sqrt(bn["var"] + eps)
    bias = bn["beta"] - bn["mean"] * scale
    return scale, bias


def init_resnet_params(key, layers=(1, 1, 1, 1), num_classes=1000):
    """block = BasicBlock (expansion=1)."""
    pg = ParamGen(key)
    params = {
        "conv1": pg.conv(64, 3, 7),
        "bn1": pg.bn(64),
    }
    inplanes = 64
    stage_planes = (64, 128, 256, 512)
    stage_strides = (1, 2, 2, 2)
    stages = []
    for planes, stride, nblocks in zip(stage_planes, stage_strides, layers):
        stage = []
        for b in range(nblocks):
            st = stride if b == 0 else 1
            blk = {
                "stride": st,
                "conv1": pg.conv(planes, inplanes, 3),
                "bn1": pg.bn(planes),
                "conv2": pg.conv(planes, planes, 3),
                "bn2": pg.bn(planes),
            }
            if st != 1 or inplanes != planes:
                blk["down_conv"] = pg.conv(planes, inplanes, 1)
                blk["down_bn"] = pg.bn(planes)
            stage.append(blk)
            inplanes = planes
        stages.append(stage)
    params["layers"] = stages
    params["fc_w"] = pg.normal((num_classes, 512), std=0.05)   # PyTorch [out, in]
    params["fc_b"] = pg.normal((num_classes,), std=0.05)
    return params


def basic_block_forward(x, blk):
    stride = blk["stride"]
    s1, b1 = bn_fold(blk["bn1"])
    h = conv2d_bn_fused(x, blk["conv1"], s1, b1, stride=stride, padding=1, relu=True)

    if "down_conv" in blk:
        sd, bd = bn_fold(blk["down_bn"])
        identity = conv2d_bn_fused(x, blk["down_conv"], sd, bd,
                                   stride=stride, padding=0, relu=False)
    else:
        identity = x

    s2, b2 = bn_fold(blk["bn2"])
    # conv2 + bn2 + residual add + final ReLU, all fused in the matmul kernel.
    out = conv2d_bn_fused(h, blk["conv2"], s2, b2, stride=1, padding=1,
                          relu=True, residual=identity)
    return out


def resnet_forward(params, x_nchw):
    x = jnp.transpose(x_nchw, (0, 2, 3, 1)).astype(jnp.float32)  # NCHW -> NHWC

    s1, b1 = bn_fold(params["bn1"])
    x = conv2d_bn_fused(x, params["conv1"], s1, b1, stride=2, padding=3, relu=True)
    x = maxpool_3x3_s2_p1(x)

    for stage in params["layers"]:
        for blk in stage:
            x = basic_block_forward(x, blk)

    feat = global_avgpool(x)                                     # (N, 512)
    logits = matmul_fused(feat, params["fc_w"].T, params["fc_b"], relu=False)
    return logits                                                # (N, 1000)


if __name__ == "__main__":
    key = jax.random.PRNGKey(0)
    params = init_resnet_params(jax.random.fold_in(key, 1), layers=(1, 1, 1, 1))
    x = jax.random.normal(jax.random.fold_in(key, 2), (2, 3, 32, 32), jnp.float32)

    out = resnet_forward(params, x)
    out = jax.block_until_ready(out)
    assert out.shape == (2, 1000), out.shape
    assert bool(jnp.all(jnp.isfinite(out)))
    print("KERNEL_OK")
</pallas_src>

<mosaic_0001>
module attributes {stable_mosaic.version = 11 : i64} {
  func.func @_mm_kernel(%arg0: i32, %arg1: memref<512x256xbf16, #tpu.memory_space<vmem>>, %arg2: memref<256x128xbf16, #tpu.memory_space<vmem>>, %arg3: memref<1x128xf32, #tpu.memory_space<vmem>>, %arg4: memref<512x128xf32, #tpu.memory_space<vmem>>) attributes {dimension_semantics = [#tpu.dimension_semantics<parallel>], iteration_bounds = array<i64: 1>, scalar_prefetch = 0 : i64, scratch_operands = 0 : i64, tpu.core_type = #tpu.core_type<tc>, window_params = [{transform_indices = @transform_0, window_bounds = array<i64: 512, 256>}, {pipeline_mode = #tpu.pipeline_mode<synchronous>, transform_indices = @transform_1, window_bounds = array<i64: 256, 128>}, {pipeline_mode = #tpu.pipeline_mode<synchronous>, transform_indices = @transform_2, window_bounds = array<i64: 1, 128>}, {transform_indices = @transform_3, window_bounds = array<i64: 512, 128>}]} {
    %c0 = arith.constant 0 : index
    %c0_0 = arith.constant 0 : index
    %0 = vector.load %arg1[%c0, %c0_0] : memref<512x256xbf16, #tpu.memory_space<vmem>>, vector<512x256xbf16>
    %c0_1 = arith.constant 0 : index
    %c0_2 = arith.constant 0 : index
    %1 = vector.load %arg2[%c0_1, %c0_2] : memref<256x128xbf16, #tpu.memory_space<vmem>>, vector<256x128xbf16>
    %cst = arith.constant dense<0.000000e+00> : vector<512x128xf32>
    %2 = tpu.matmul %0, %1, %cst {dimension_numbers = #tpu.dot_dimension_numbers<[1], [0], [0], [1], [0, 0, 1, 1], [], []>} : vector<512x256xbf16>, vector<256x128xbf16>, vector<512x128xf32> -> vector<512x128xf32>
    %c0_3 = arith.constant 0 : index
    %c0_4 = arith.constant 0 : index
    %3 = vector.load %arg3[%c0_3, %c0_4] : memref<1x128xf32, #tpu.memory_space<vmem>>, vector<1x128xf32>
    %4 = vector.broadcast %3 : vector<1x128xf32> to vector<512x128xf32>
    %5 = arith.addf %2, %4 : vector<512x128xf32>
    %cst_5 = arith.constant 0.000000e+00 : f32
    %6 = vector.broadcast %cst_5 : f32 to vector<512x128xf32>
    %7 = arith.maximumf %5, %6 : vector<512x128xf32>
    %c0_6 = arith.constant 0 : index
    %c0_7 = arith.constant 0 : index
    %8 = vector.load %arg4[%c0_6, %c0_7] : memref<512x128xf32, #tpu.memory_space<vmem>>, vector<512x128xf32>
    tpu.vector_store %arg4[%c0_6, %c0_7], %7 {strides = array<i32>} : memref<512x128xf32, #tpu.memory_space<vmem>>, vector<512x128xf32>,
    return
  }
  func.func @transform_0(%arg0: i32) -> (i32, i32) {
    %c0_i32 = arith.constant 0 : i32
    %c0_i32_0 = arith.constant 0 : i32
    return %arg0, %c0_i32 : i32, i32
  }
  func.func @transform_1(%arg0: i32) -> (i32, i32) {
    %c0_i32 = arith.constant 0 : i32
    %c0_i32_0 = arith.constant 0 : i32
    %c0_i32_1 = arith.constant 0 : i32
    return %c0_i32, %c0_i32_0 : i32, i32
  }
  func.func @transform_2(%arg0: i32) -> (i32, i32) {
    %c0_i32 = arith.constant 0 : i32
    %c0_i32_0 = arith.constant 0 : i32
    %c0_i32_1 = arith.constant 0 : i32
    return %c0_i32, %c0_i32_0 : i32, i32
  }
  func.func @transform_3(%arg0: i32) -> (i32, i32) {
    %c0_i32 = arith.constant 0 : i32
    %c0_i32_0 = arith.constant 0 : i32
    return %arg0, %c0_i32 : i32, i32
  }
}

</mosaic_0001>

<bundles_post_ra>
// kernel: tpu_custom_call.1
= control target key start
LH: loop header
LB: loop body
LE: loop exit
PB: predicated region body
PF: predicated region fallthrough
CT: control target
= control target key end

     0   :  { %8 = vsyncpa [#allocation3], 0  ;;  %s1474_s0 = inlined_call_operand.hbm [shape: bf16[512,256], index: 0, kind: input, shape index: {}]   ;;  %s1475_s1 = inlined_call_operand.hbm [shape: bf16[256,128], index: 1, kind: input, shape index: {}]   ;;  %s1476_s2 = inlined_call_operand.vmem [shape: f32[1,128], index: 2, kind: input, shape index: {}]   ;;  %s1477_s3 = inlined_call_operand.hbm [shape: f32[512,128], index: 3, kind: output, shape index: {}]  }
   0x1   :  { %9 = vsyncpa [#allocation6], 0 }
   0x2   :  { %10 = vsyncpa [#allocation4], 0  ;;  %s1303_s12 = smov [#allocation2]   ;;  %s1231_s16 = scalar_lea.hbm %s1474_s0, 8192 }
   0x3   :  { %s16_s13 = sshll.u32 %s1303_s12, 4  ;;  %p1232_p0 = scmp.ne.s32.totalorder %s1474_s0, %s1231_s16  ;;  %s17_s13 = int_to_ptr.vmem [resolvable:$true] %s16_s13 }
   0x4   :  { %p1235_p1 = scmp.lt.u32.totalorder %s1231_s16, %s1474_s0 }
   0x6   :  { %p1237_p2 = pnand %p1235_p1, %p1232_p0 }
   0x8   :  { %1240 = shalt.err (!%p1237_p2)
}
   0x9   :  { %s1241_s21 = scalar_lea.vmem %s17_s13, 8192  ;;  %p1246_p4 = scmp.lt.s32.totalorder %s17_s13, %s17_s13 }
   0xa   :  { %p1242_p3 = scmp.ne.s32.totalorder %s17_s13, %s1241_s21  ;;  %p1247_p5 = scmp.lt.s32.totalorder %s1241_s21, %s1241_s21 }
   0xc   :  { %p1248_p6 = por %p1247_p5, %p1246_p4 }
   0xe   :  { %p1249_p7 = pnand %p1248_p6, %p1242_p3 }
  0x10   :  { %1252 = shalt.err (!%p1249_p7)
}
  0x11   :  { %s1304_s22 = smov 128   ;;  %s1305_s23 = smov 8  }
  0x12   :  { %22 = dma.hbm_to_vmem [thread:$0]  %s1474_s0, 8192, %s17_s13, [#allocation3], %s1304_s22, %s1304_s22, %s1305_s23  }
  0x13   :  { %s1306_s26 = smov [#allocation5]   ;;  %s1253_s30 = scalar_lea.hbm %s1475_s1, 2048 }
  0x14   :  { %s28_s27 = sshll.u32 %s1306_s26, 4  ;;  %p1254_p8 = scmp.ne.s32.totalorder %s1475_s1, %s1253_s30  ;;  %s29_s27 = int_to_ptr.vmem [resolvable:$true] %s28_s27 }
  0x15   :  { %p1257_p9 = scmp.lt.u32.totalorder %s1253_s30, %s1475_s1 }
  0x17   :  { %p1259_p10 = pnand %p1257_p9, %p1254_p8 }
  0x19   :  { %1262 = shalt.err (!%p1259_p10)
}
  0x1a   :  { %s1263_s8 = scalar_lea.vmem %s29_s27, 2048  ;;  %p1268_p12 = scmp.lt.s32.totalorder %s29_s27, %s29_s27 }
  0x1b   :  { %p1264_p11 = scmp.ne.s32.totalorder %s29_s27, %s1263_s8  ;;  %p1269_p13 = scmp.lt.s32.totalorder %s1263_s8, %s1263_s8 }
  0x1d   :  { %p1270_p0 = por %p1269_p13, %p1268_p12 }
  0x1f   :  { %p1271_p1 = pnand %p1270_p0, %p1264_p11 }
  0x21   :  { %1274 = shalt.err (!%p1271_p1)
}
  0x22   :  { %s1307_s0 = smov 64   ;;  %s1308_s9 = smov 4  }
  0x23   :  { %34 = dma.hbm_to_vmem [thread:$0]  %s1475_s1, 2048, %s29_s27, [#allocation6], %s1307_s0, %s1307_s0, %s1308_s9  }
  0x24   :  { %1297 = dma.done.wait [#allocation3], 8192  }
  0x25   :  { %1298 = vsyncadd [#allocation3], 4294959104 }
  0x26   :  { %1299 = dma.done.wait [#allocation6], 2048  }
  0x27   :  { %1300 = vsyncadd [#allocation6], 4294965248  ;;  %v1309_v0 = vmov 0   ;;  %v1119_v1 = vld [vmem:[#allocation5] sm:$0xff]   ;;  %v1120_v2 = vld [vmem:[#allocation5 + $0x8] sm:$0xff]  }
  0x28   :  { %563 = vmatprep.subr.bf16.mxu0 %v1309_v0  ;;  %1079 = vmatprep.subr.bf16.mxu1 %v1309_v0  ;;  %v1121_v3 = vld [vmem:[#allocation5 + $0x10] sm:$0xff]   ;;  %v1122_v4 = vld [vmem:[#allocation5 + $0x18] sm:$0xff]   ;;  %v1123_v5 = vld [vmem:[#allocation5 + $0x20] sm:$0xff]  }
  0x29   :  { %564 = vmatpush1.bf16.msra.mxu0 %v1119_v1  ;;  %1095 = vmatpush1.bf16.msra.mxu1 %v1119_v1  ;;  %v1137_v6 = vld [vmem:[#allocation2 + $0x4] ss:$8 sps:$4 sm:$0xff]   ;;  %v1125_v9 = vld [vmem:[#allocation5 + $0x30] sm:$0xff]   ;;  %v1126_v10 = vld [vmem:[#allocation5 + $0x38] sm:$0xff]  }
  0x2a   :  { %565 = vmatprep.subr.bf16.mxu0 %v1309_v0  ;;  %1080 = vmatprep.subr.bf16.mxu1 %v1309_v0  ;;  %v1124_v7 = vld [vmem:[#allocation5 + $0x28] sm:$0xff]   ;;  %v1127_v11 = vld [vmem:[#allocation5 + $0x40] sm:$0xff]   ;;  %v1129_v13 = vld [vmem:[#allocation5 + $0x50] sm:$0xff]  }
  0x2b   :  { %v1140_v8 = vld [vmem:[#allocation2 + $0x104] ss:$8 sps:$4 sm:$0xff]   ;;  %595 = vmatprep.mubr.bf16.mxu0 %v1137_v6  ;;  %v1130_v14 = vld [vmem:[#allocation5 + $0x58] sm:$0xff]   ;;  %v1133_v17 = vld [vmem:[#allocation5 + $0x70] sm:$0xff]  }
  0x2c   :  { %723 = vmatprep.mubr.bf16.mxu1 %v1140_v8  ;;  %v1128_v12 = vld [vmem:[#allocation5 + $0x48] sm:$0xff]   ;;  %v1131_v15 = vld [vmem:[#allocation5 + $0x60] sm:$0xff]   ;;  %v1134_v18 = vld [vmem:[#allocation5 + $0x78] sm:$0xff]  }
  0x2d   :  { %566 = vmatpush1.bf16.msra.mxu0 %v1120_v2  ;;  %1096 = vmatpush1.bf16.msra.mxu1 %v1120_v2  ;;  %v1132_v16 = vld [vmem:[#allocation5 + $0x68] sm:$0xff]   ;;  %v1141_v21 = vld [vmem:[#allocation2 + $0x14] ss:$8 sps:$4 sm:$0xff]   ;;  %v1145_v23 = vld [vmem:[#allocation2 + $0x10] ss:$8 sps:$4 sm:$0xff]  }
  0x2e   :  { %567 = vmatprep.subr.bf16.mxu0 %v1309_v0  ;;  %1081 = vmatprep.subr.bf16.mxu1 %v1309_v0  ;;  %v1135_v19 = vld [vmem:[#allocation2] ss:$8 sps:$4 sm:$0xff]   ;;  %v1143_v22 = vld [vmem:[#allocation2 + $0x114] ss:$8 sps:$4 sm:$0xff]   ;;  %v1146_v24 = vld [vmem:[#allocation2 + $0x110] ss:$8 sps:$4 sm:$0xff]  }
  0x2f   :  { %v1138_v20 = vld [vmem:[#allocation2 + $0x100] ss:$8 sps:$4 sm:$0xff]   ;;  %v1147_v25 = vld [vmem:[#allocation2 + $0x24] ss:$8 sps:$4 sm:$0xff]   ;;  %v1153_v29 = vld [vmem:[#allocation2 + $0x34] ss:$8 sps:$4 sm:$0xff]  }
  0x30   :  { %v1149_v26 = vld [vmem:[#allocation2 + $0x124] ss:$8 sps:$4 sm:$0xff]   ;;  %v1151_v27 = vld [vmem:[#allocation2 + $0x20] ss:$8 sps:$4 sm:$0xff]   ;;  %v1155_v30 = vld [vmem:[#allocation2 + $0x134] ss:$8 sps:$4 sm:$0xff]  }
  0x31   :  { %568 = vmatpush1.bf16.msra.mxu0 %v1121_v3  ;;  %1097 = vmatpush1.bf16.msra.mxu1 %v1121_v3  ;;  %v1152_v28 = vld [vmem:[#allocation2 + $0x120] ss:$8 sps:$4 sm:$0xff]   ;;  %v1157_v31 = vld [vmem:[#allocation2 + $0x30] ss:$8 sps:$4 sm:$0xff]   ;;  %v1159_v33 = vld [vmem:[#allocation2 + $0x44] ss:$8 sps:$4 sm:$0xff]  }
  0x32   :  { %569 = vmatprep.subr.bf16.mxu0 %v1309_v0  ;;  %1082 = vmatprep.subr.bf16.mxu1 %v1309_v0  ;;  %v1158_v32 = vld [vmem:[#allocation2 + $0x130] ss:$8 sps:$4 sm:$0xff]   ;;  %v1161_v34 = vld [vmem:[#allocation2 + $0x144] ss:$8 sps:$4 sm:$0xff]   ;;  %v1163_v35 = vld [vmem:[#allocation2 + $0x40] ss:$8 sps:$4 sm:$0xff]  }
  0x33   :  { %v1164_v36 = vld [vmem:[#allocation2 + $0x140] ss:$8 sps:$4 sm:$0xff]   ;;  %v1165_v37 = vld [vmem:[#allocation2 + $0x54] ss:$8 sps:$4 sm:$0xff]   ;;  %v1169_v39 = vld [vmem:[#allocation2 + $0x50] ss:$8 sps:$4 sm:$0xff]  }
  0x34   :  { %v1167_v38 = vld [vmem:[#allocation2 + $0x154] ss:$8 sps:$4 sm:$0xff]   ;;  %v1170_v40 = vld [vmem:[#allocation2 + $0x150] ss:$8 sps:$4 sm:$0xff]   ;;  %v1171_v41 = vld [vmem:[#allocation2 + $0x64] ss:$8 sps:$4 sm:$0xff]  }
  0x35   :  { %570 = vmatpush1.bf16.msra.mxu0 %v1122_v4  ;;  %1098 = vmatpush1.bf16.msra.mxu1 %v1122_v4  ;;  %v1173_v42 = vld [vmem:[#allocation2 + $0x164] ss:$8 sps:$4 sm:$0xff]   ;;  %v1175_v43 = vld [vmem:[#allocation2 + $0x60] ss:$8 sps:$4 sm:$0xff]   ;;  %v1177_v45 = vld [vmem:[#allocation2 + $0x74] ss:$8 sps:$4 sm:$0xff]  }
  0x36   :  { %571 = vmatprep.subr.bf16.mxu0 %v1309_v0  ;;  %1083 = vmatprep.subr.bf16.mxu1 %v1309_v0  ;;  %v1176_v44 = vld [vmem:[#allocation2 + $0x160] ss:$8 sps:$4 sm:$0xff]   ;;  %v1179_v46 = vld [vmem:[#allocation2 + $0x174] ss:$8 sps:$4 sm:$0xff]   ;;  %v1181_v47 = vld [vmem:[#allocation2 + $0x70] ss:$8 sps:$4 sm:$0xff]  }
  0x37   :  { %v1182_v48 = vld [vmem:[#allocation2 + $0x170] ss:$8 sps:$4 sm:$0xff]   ;;  %v1183_v49 = vld [vmem:[#allocation2 + $0x84] ss:$8 sps:$4 sm:$0xff]   ;;  %v1187_v51 = vld [vmem:[#allocation2 + $0x80] ss:$8 sps:$4 sm:$0xff]  }
  0x38   :  { %v1185_v50 = vld [vmem:[#allocation2 + $0x184] ss:$8 sps:$4 sm:$0xff]   ;;  %v1188_v52 = vld [vmem:[#allocation2 + $0x180] ss:$8 sps:$4 sm:$0xff]   ;;  %v1189_v53 = vld [vmem:[#allocation2 + $0x94] ss:$8 sps:$4 sm:$0xff]  }
  0x39   :  { %572 = vmatpush1.bf16.msra.mxu0 %v1123_v5  ;;  %1099 = vmatpush1.bf16.msra.mxu1 %v1123_v5  ;;  %v1191_v54 = vld [vmem:[#allocation2 + $0x194] ss:$8 sps:$4 sm:$0xff]   ;;  %v1193_v55 = vld [vmem:[#allocation2 + $0x90] ss:$8 sps:$4 sm:$0xff]   ;;  %v1195_v57 = vld [vmem:[#allocation2 + $0xa4] ss:$8 sps:$4 sm:$0xff]  }
  0x3a   :  { %573 = vmatprep.subr.bf16.mxu0 %v1309_v0  ;;  %1084 = vmatprep.subr.bf16.mxu1 %v1309_v0  ;;  %v1194_v56 = vld [vmem:[#allocation2 + $0x190] ss:$8 sps:$4 sm:$0xff]   ;;  %v1197_v58 = vld [vmem:[#allocation2 + $0x1a4] ss:$8 sps:$4 sm:$0xff]   ;;  %v1199_v59 = vld [vmem:[#allocation2 + $0xa0] ss:$8 sps:$4 sm:$0xff]  }
  0x3b   :  { %v1200_v60 = vld [vmem:[#allocation2 + $0x1a0] ss:$8 sps:$4 sm:$0xff]   ;;  %v1201_v61 = vld [vmem:[#allocation2 + $0xb4] ss:$8 sps:$4 sm:$0xff]   ;;  %v1205_v63 = vld [vmem:[#allocation2 + $0xb0] ss:$8 sps:$4 sm:$0xff]  }
  0x3c   :  { %v1203_v62 = vld [vmem:[#allocation2 + $0x1b4] ss:$8 sps:$4 sm:$0xff]   ;;  %v1207_v1 = vld [vmem:[#allocation2 + $0xc4] ss:$8 sps:$4 sm:$0xff]   ;;  %v1211_v3 = vld [vmem:[#allocation2 + $0xc0] ss:$8 sps:$4 sm:$0xff]  }
  0x3d   :  { %574 = vmatpush1.bf16.msra.mxu0 %v1124_v7  ;;  %1100 = vmatpush1.bf16.msra.mxu1 %v1124_v7  ;;  %v1209_v2 = vld [vmem:[#allocation2 + $0x1c4] ss:$8 sps:$4 sm:$0xff]   ;;  %v1212_v4 = vld [vmem:[#allocation2 + $0x1c0] ss:$8 sps:$4 sm:$0xff]   ;;  %v1213_v5 = vld [vmem:[#allocation2 + $0xd4] ss:$8 sps:$4 sm:$0xff]  }
  0x3e   :  { %575 = vmatprep.subr.bf16.mxu0 %v1309_v0  ;;  %1085 = vmatprep.subr.bf16.mxu1 %v1309_v0  ;;  %v1215_v6 = vld [vmem:[#allocation2 + $0x1d4] ss:$8 sps:$4 sm:$0xff]   ;;  %v1217_v7 = vld [vmem:[#allocation2 + $0xd0] ss:$8 sps:$4 sm:$0xff]  }
  0x3f   :  { %v1218_v8 = vld [vmem:[#allocation2 + $0x1d0] ss:$8 sps:$4 sm:$0xff]  }
  0x41   :  { %576 = vmatpush1.bf16.msra.mxu0 %v1125_v9  ;;  %1101 = vmatpush1.bf16.msra.mxu1 %v1125_v9  ;;  %v1219_v9 = vld [vmem:[#allocation2 + $0xe4] ss:$8 sps:$4 sm:$0xff]  }
  0x42   :  { %577 = vmatprep.subr.bf16.mxu0 %v1309_v0  ;;  %1086 = vmatprep.subr.bf16.mxu1 %v1309_v0 }
  0x45   :  { %578 = vmatpush1.bf16.msra.mxu0 %v1126_v10  ;;  %1102 = vmatpush1.bf16.msra.mxu1 %v1126_v10  ;;  %v1221_v10 = vld [vmem:[#allocation2 + $0x1e4] ss:$8 sps:$4 sm:$0xff]  }
  0x46   :  { %579 = vmatprep.subr.bf16.mxu0 %v1309_v0  ;;  %1087 = vmatprep.subr.bf16.mxu1 %v1309_v0 }
  0x49   :  { %580 = vmatpush1.bf16.msra.mxu0 %v1127_v11  ;;  %1103 = vmatpush1.bf16.msra.mxu1 %v1127_v11  ;;  %v1223_v11 = vld [vmem:[#allocation2 + $0xe0] ss:$8 sps:$4 sm:$0xff]  }
  0x4a   :  { %581 = vmatprep.subr.bf16.mxu0 %v1309_v0  ;;  %1088 = vmatprep.subr.bf16.mxu1 %v1309_v0 }
  0x4d   :  { %582 = vmatpush1.bf16.msra.mxu0 %v1128_v12  ;;  %1104 = vmatpush1.bf16.msra.mxu1 %v1128_v12  ;;  %v1224_v12 = vld [vmem:[#allocation2 + $0x1e0] ss:$8 sps:$4 sm:$0xff]  }
  0x4e   :  { %583 = vmatprep.subr.bf16.mxu0 %v1309_v0  ;;  %1089 = vmatprep.subr.bf16.mxu1 %v1309_v0 }
  0x51   :  { %584 = vmatpush1.bf16.msra.mxu0 %v1129_v13  ;;  %1105 = vmatpush1.bf16.msra.mxu1 %v1129_v13  ;;  %v1225_v13 = vld [vmem:[#allocation2 + $0xf4] ss:$8 sps:$4 sm:$0xff]  }
  0x52   :  { %585 = vmatprep.subr.bf16.mxu0 %v1309_v0  ;;  %1090 = vmatprep.subr.bf16.mxu1 %v1309_v0 }
  0x55   :  { %586 = vmatpush1.bf16.msra.mxu0 %v1130_v14  ;;  %1106 = vmatpush1.bf16.msra.mxu1 %v1130_v14  ;;  %v1227_v14 = vld [vmem:[#allocation2 + $0x1f4] ss:$8 sps:$4 sm:$0xff]  }
  0x56   :  { %587 = vmatprep.subr.bf16.mxu0 %v1309_v0  ;;  %1091 = vmatprep.subr.bf16.mxu1 %v1309_v0 }
  0x59   :  { %588 = vmatpush1.bf16.msra.mxu0 %v1131_v15  ;;  %1107 = vmatpush1.bf16.msra.mxu1 %v1131_v15  ;;  %v1229_v15 = vld [vmem:[#allocation2 + $0xf0] ss:$8 sps:$4 sm:$0xff]  }
  0x5a   :  { %589 = vmatprep.subr.bf16.mxu0 %v1309_v0  ;;  %1092 = vmatprep.subr.bf16.mxu1 %v1309_v0 }
  0x5d   :  { %590 = vmatpush1.bf16.msra.mxu0 %v1132_v16  ;;  %1108 = vmatpush1.bf16.msra.mxu1 %v1132_v16  ;;  %v1230_v16 = vld [vmem:[#allocation2 + $0x1f0] ss:$8 sps:$4 sm:$0xff]  }
  0x5e   :  { %591 = vmatprep.subr.bf16.mxu0 %v1309_v0  ;;  %1093 = vmatprep.subr.bf16.mxu1 %v1309_v0 }
  0x61   :  { %592 = vmatpush1.bf16.msra.mxu0 %v1133_v17  ;;  %1109 = vmatpush1.bf16.msra.mxu1 %v1133_v17  ;;  %v1393_v17 = vld [vmem:[%s1476_s2] ss:$0 sm:$0xff]  ;;  %s1310_s2 = smov [#allocation7]  }
  0x62   :  { %593 = vmatprep.subr.bf16.mxu0 %v1309_v0  ;;  %1094 = vmatprep.subr.bf16.mxu1 %v1309_v0  ;;  %v1206_v0 = vld [vmem:[#allocation2 + $0x1b0] ss:$8 sps:$4 sm:$0xff]   ;;  %s985_s13 = sshll.u32 %s1310_s2, 4  ;;  %s986_s13 = int_to_ptr.vmem [resolvable:$true] %s985_s13 }
  0x63   :  { %s1275_s14 = scalar_lea.vmem %s986_s13, 8192  ;;  %p1280_p3 = scmp.lt.s32.totalorder %s986_s13, %s986_s13 }
  0x64   :  { %p1276_p2 = scmp.ne.s32.totalorder %s986_s13, %s1275_s14  ;;  %p1281_p4 = scmp.lt.s32.totalorder %s1275_s14, %s1275_s14 }
  0x65   :  { %594 = vmatpush1.bf16.msra.mxu0 %v1134_v18  ;;  %1110 = vmatpush1.bf16.msra.mxu1 %v1134_v18 }
  0x66   :  { %p1282_p5 = por %p1281_p4, %p1280_p3 }
  0x68   :  { %596 = vmatmul.mubr.bf16.vlgmr.msra.gmra.mrb[0].mxu0 %v1135_v19  ;;  %724 = vmatmul.mubr.bf16.vlgmr.msra.gmra.mrb[0].mxu1 %v1138_v20  ;;  %p1283_p6 = pnand %p1282_p5, %p1276_p2 }
  0x69   :  { %603 = vmatprep.mubr.bf16.mxu0 %v1141_v21  ;;  %731 = vmatprep.mubr.bf16.mxu1 %v1143_v22 }
  0x70   :  { %604 = vmatmul.mubr.bf16.gmra.mrb[4].mxu0 %v1145_v23  ;;  %732 = vmatmul.mubr.bf16.gmra.mrb[4].mxu1 %v1146_v24 }
  0x71   :  { %611 = vmatprep.mubr.bf16.mxu0 %v1147_v25  ;;  %739 = vmatprep.mubr.bf16.mxu1 %v1149_v26 }
  0x78   :  { %612 = vmatmul.mubr.bf16.gmra.mrb[8].mxu0 %v1151_v27  ;;  %740 = vmatmul.mubr.bf16.gmra.mrb[8].mxu1 %v1152_v28 }
  0x79   :  { %619 = vmatprep.mubr.bf16.mxu0 %v1153_v29  ;;  %747 = vmatprep.mubr.bf16.mxu1 %v1155_v30 }
  0x80   :  { %620 = vmatmul.mubr.bf16.gmra.mrb[12].mxu0 %v1157_v31  ;;  %748 = vmatmul.mubr.bf16.gmra.mrb[12].mxu1 %v1158_v32 }
  0x81   :  { %627 = vmatprep.mubr.bf16.mxu0 %v1159_v33  ;;  %755 = vmatprep.mubr.bf16.mxu1 %v1161_v34 }
  0x88   :  { %628 = vmatmul.mubr.bf16.gmra.mrb[16].mxu0 %v1163_v35  ;;  %756 = vmatmul.mubr.bf16.gmra.mrb[16].mxu1 %v1164_v36 }
  0x89   :  { %635 = vmatprep.mubr.bf16.mxu0 %v1165_v37  ;;  %763 = vmatprep.mubr.bf16.mxu1 %v1167_v38 }
  0x90   :  { %636 = vmatmul.mubr.bf16.gmra.mrb[20].mxu0 %v1169_v39  ;;  %764 = vmatmul.mubr.bf16.gmra.mrb[20].mxu1 %v1170_v40 }
  0x91   :  { %643 = vmatprep.mubr.bf16.mxu0 %v1171_v41  ;;  %771 = vmatprep.mubr.bf16.mxu1 %v1173_v42 }
  0x98   :  { %644 = vmatmul.mubr.bf16.gmra.mrb[24].mxu0 %v1175_v43  ;;  %772 = vmatmul.mubr.bf16.gmra.mrb[24].mxu1 %v1176_v44 }
  0x99   :  { %651 = vmatprep.mubr.bf16.mxu0 %v1177_v45  ;;  %779 = vmatprep.mubr.bf16.mxu1 %v1179_v46 }
  0xa0   :  { %652 = vmatmul.mubr.bf16.gmra.mrb[28].mxu0 %v1181_v47  ;;  %780 = vmatmul.mubr.bf16.gmra.mrb[28].mxu1 %v1182_v48 }
  0xa1   :  { %659 = vmatprep.mubr.bf16.mxu0 %v1183_v49  ;;  %787 = vmatprep.mubr.bf16.mxu1 %v1185_v50 }
  0xa8   :  { %660 = vmatmul.mubr.bf16.gmra.mrb[32].mxu0 %v1187_v51  ;;  %788 = vmatmul.mubr.bf16.gmra.mrb[32].mxu1 %v1188_v52 }
  0xa9   :  { %667 = vmatprep.mubr.bf16.mxu0 %v1189_v53  ;;  %795 = vmatprep.mubr.bf16.mxu1 %v1191_v54 }
  0xb0   :  { %668 = vmatmul.mubr.bf16.gmra.mrb[36].mxu0 %v1193_v55  ;;  %796 = vmatmul.mubr.bf16.gmra.mrb[36].mxu1 %v1194_v56 }
  0xb1   :  { %675 = vmatprep.mubr.bf16.mxu0 %v1195_v57  ;;  %803 = vmatprep.mubr.bf16.mxu1 %v1197_v58 }
  0xb8   :  { %676 = vmatmul.mubr.bf16.gmra.mrb[40].mxu0 %v1199_v59  ;;  %804 = vmatmul.mubr.bf16.gmra.mrb[40].mxu1 %v1200_v60 }
  0xb9   :  { %683 = vmatprep.mubr.bf16.mxu0 %v1201_v61  ;;  %811 = vmatprep.mubr.bf16.mxu1 %v1203_v62 }
  0xc0   :  { %684 = vmatmul.mubr.bf16.gmra.mrb[44].mxu0 %v1205_v63  ;;  %812 = vmatmul.mubr.bf16.gmra.mrb[44].mxu1 %v1206_v0 }
  0xc1   :  { %691 = vmatprep.mubr.bf16.mxu0 %v1207_v1  ;;  %819 = vmatprep.mubr.bf16.mxu1 %v1209_v2 }
  0xc8   :  { %692 = vmatmul.mubr.bf16.gmra.mrb[48].mxu0 %v1211_v3  ;;  %820 = vmatmul.mubr.bf16.gmra.mrb[48].mxu1 %v1212_v4 }
  0xc9   :  { %699 = vmatprep.mubr.bf16.mxu0 %v1213_v5  ;;  %827 = vmatprep.mubr.bf16.mxu1 %v1215_v6 }
  0xd0   :  { %700 = vmatmul.mubr.bf16.gmra.mrb[52].mxu0 %v1217_v7  ;;  %828 = vmatmul.mubr.bf16.gmra.mrb[52].mxu1 %v1218_v8 }
  0xd1   :  { %707 = vmatprep.mubr.bf16.mxu0 %v1219_v9  ;;  %835 = vmatprep.mubr.bf16.mxu1 %v1221_v10 }
  0xd8   :  { %708 = vmatmul.mubr.bf16.gmra.mrb[56].mxu0 %v1223_v11  ;;  %836 = vmatmul.mubr.bf16.gmra.mrb[56].mxu1 %v1224_v12 }
  0xd9   :  { %715 = vmatprep.mubr.bf16.mxu0 %v1225_v13  ;;  %843 = vmatprep.mubr.bf16.mxu1 %v1227_v14 }
  0xe0   :  { %716 = vmatmul.mubr.bf16.gmra.mrb[60].mxu0 %v1229_v15  ;;  %844 = vmatmul.mubr.bf16.gmra.mrb[60].mxu1 %v1230_v16 }
 0x13b   :  { %v597_v18 = vpop.f32.mrb[0].mxu0  ;;  %v725_v19 = vpop.f32.mrb[0].mxu1 }
 0x13c   :  { %v598_v20 = vadd.f32 %v1393_v17, %v597_v18  ;;  %v726_v21 = vadd.f32 %v1393_v17, %v725_v19  ;;  %v599_v22 = vpop.f32.mrb[1].mxu0  ;;  %v727_v23 = vpop.f32.mrb[1].mxu1 }
 0x13d   :  { %v600_v24 = vpop.f32.mrb[2].mxu0  ;;  %v728_v25 = vpop.f32.mrb[2].mxu1 }
 0x13e   :  { %v852_v26 = vmax.f32 %v598_v20, 0.0  ;;  %v884_v27 = vmax.f32 %v726_v21, 0.0  ;;  %v601_v28 = vadd.f32 %v1393_v17, %v600_v24  ;;  %v729_v29 = vadd.f32 %v1393_v17, %v728_v25  ;;  %v602_v30 = vpop.f32.mrb[3].mxu0  ;;  %v730_v31 = vpop.f32.mrb[3].mxu1 }
 0x140   :  { %916 = vst [vmem:[#allocation7] sm:$0xff] %v852_v26  ;;  %948 = vst [vmem:[#allocation7 + $0x100] sm:$0xff] %v884_v27  ;;  %v853_v32 = vmax.f32 %v601_v28, 0.0  ;;  %v885_v33 = vmax.f32 %v729_v29, 0.0 }
 0x142   :  { %917 = vst [vmem:[#allocation7 + $0x8] sm:$0xff] %v853_v32  ;;  %949 = vst [vmem:[#allocation7 + $0x108] sm:$0xff] %v885_v33 }
 0x143   :  { %v605_v34 = vpop.f32.mrb[4].mxu0  ;;  %v733_v35 = vpop.f32.mrb[4].mxu1 }
 0x144   :  { %v606_v36 = vadd.f32 %v1393_v17, %v605_v34  ;;  %v734_v37 = vadd.f32 %v1393_v17, %v733_v35  ;;  %v607_v38 = vpop.f32.mrb[5].mxu0  ;;  %v735_v39 = vpop.f32.mrb[5].mxu1 }
 0x145   :  { %v608_v40 = vpop.f32.mrb[6].mxu0  ;;  %v736_v41 = vpop.f32.mrb[6].mxu1 }
 0x146   :  { %v854_v42 = vmax.f32 %v606_v36, 0.0  ;;  %v886_v43 = vmax.f32 %v734_v37, 0.0  ;;  %v609_v44 = vadd.f32 %v1393_v17, %v608_v40  ;;  %v737_v45 = vadd.f32 %v1393_v17, %v736_v41  ;;  %v610_v46 = vpop.f32.mrb[7].mxu0  ;;  %v738_v47 = vpop.f32.mrb[7].mxu1 }
 0x148   :  { %918 = vst [vmem:[#allocation7 + $0x10] sm:$0xff] %v854_v42  ;;  %950 = vst [vmem:[#allocation7 + $0x110] sm:$0xff] %v886_v43  ;;  %v855_v48 = vmax.f32 %v609_v44, 0.0  ;;  %v887_v49 = vmax.f32 %v737_v45, 0.0 }
 0x14a   :  { %919 = vst [vmem:[#allocation7 + $0x18] sm:$0xff] %v855_v48  ;;  %951 = vst [vmem:[#allocation7 + $0x118] sm:$0xff] %v887_v49 }
 0x14b   :  { %v613_v50 = vpop.f32.mrb[8].mxu0  ;;  %v741_v51 = vpop.f32.mrb[8].mxu1 }
 0x14c   :  { %v614_v52 = vadd.f32 %v1393_v17, %v613_v50  ;;  %v742_v53 = vadd.f32 %v1393_v17, %v741_v51  ;;  %v615_v54 = vpop.f32.mrb[9].mxu0  ;;  %v743_v55 = vpop.f32.mrb[9].mxu1 }
 0x14d   :  { %v616_v56 = vpop.f32.mrb[10].mxu0  ;;  %v744_v57 = vpop.f32.mrb[10].mxu1 }
 0x14e   :  { %v856_v58 = vmax.f32 %v614_v52, 0.0  ;;  %v888_v59 = vmax.f32 %v742_v53, 0.0  ;;  %v617_v60 = vadd.f32 %v1393_v17, %v616_v56  ;;  %v745_v61 = vadd.f32 %v1393_v17, %v744_v57  ;;  %v618_v62 = vpop.f32.mrb[11].mxu0  ;;  %v746_v63 = vpop.f32.mrb[11].mxu1 }
 0x150   :  { %920 = vst [vmem:[#allocation7 + $0x20] sm:$0xff] %v856_v58  ;;  %952 = vst [vmem:[#allocation7 + $0x120] sm:$0xff] %v888_v59  ;;  %v857_v0 = vmax.f32 %v617_v60, 0.0  ;;  %v889_v1 = vmax.f32 %v745_v61, 0.0 }
 0x152   :  { %921 = vst [vmem:[#allocation7 + $0x28] sm:$0xff] %v857_v0  ;;  %953 = vst [vmem:[#allocation7 + $0x128] sm:$0xff] %v889_v1 }
 0x153   :  { %v621_v2 = vpop.f32.mrb[12].mxu0  ;;  %v749_v3 = vpop.f32.mrb[12].mxu1 }
 0x154   :  { %v622_v4 = vadd.f32 %v1393_v17, %v621_v2  ;;  %v750_v5 = vadd.f32 %v1393_v17, %v749_v3  ;;  %v623_v6 = vpop.f32.mrb[13].mxu0  ;;  %v751_v7 = vpop.f32.mrb[13].mxu1 }
 0x155   :  { %v624_v8 = vpop.f32.mrb[14].mxu0  ;;  %v752_v9 = vpop.f32.mrb[14].mxu1 }
 0x156   :  { %v858_v10 = vmax.f32 %v622_v4, 0.0  ;;  %v890_v11 = vmax.f32 %v750_v5, 0.0  ;;  %v625_v12 = vadd.f32 %v1393_v17, %v624_v8  ;;  %v753_v13 = vadd.f32 %v1393_v17, %v752_v9  ;;  %v626_v14 = vpop.f32.mrb[15].mxu0  ;;  %v754_v15 = vpop.f32.mrb[15].mxu1 }
 0x158   :  { %922 = vst [vmem:[#allocation7 + $0x30] sm:$0xff] %v858_v10  ;;  %954 = vst [vmem:[#allocation7 + $0x130] sm:$0xff] %v890_v11  ;;  %v859_v16 = vmax.f32 %v625_v12, 0.0  ;;  %v891_v18 = vmax.f32 %v753_v13, 0.0 }
 0x15a   :  { %923 = vst [vmem:[#allocation7 + $0x38] sm:$0xff] %v859_v16  ;;  %955 = vst [vmem:[#allocation7 + $0x138] sm:$0xff] %v891_v18 }
 0x15b   :  { %v629_v19 = vpop.f32.mrb[16].mxu0  ;;  %v757_v20 = vpop.f32.mrb[16].mxu1 }
 0x15c   :  { %v630_v21 = vadd.f32 %v1393_v17, %v629_v19  ;;  %v758_v22 = vadd.f32 %v1393_v17, %v757_v20  ;;  %v631_v23 = vpop.f32.mrb[17].mxu0  ;;  %v759_v24 = vpop.f32.mrb[17].mxu1 }
 0x15d   :  { %v632_v25 = vpop.f32.mrb[18].mxu0  ;;  %v760_v26 = vpop.f32.mrb[18].mxu1 }
 0x15e   :  { %v860_v27 = vmax.f32 %v630_v21, 0.0  ;;  %v892_v28 = vmax.f32 %v758_v22, 0.0  ;;  %v633_v29 = vadd.f32 %v1393_v17, %v632_v25  ;;  %v761_v30 = vadd.f32 %v1393_v17, %v760_v26  ;;  %v634_v31 = vpop.f32.mrb[19].mxu0  ;;  %v762_v32 = vpop.f32.mrb[19].mxu1 }
 0x160   :  { %924 = vst [vmem:[#allocation7 + $0x40] sm:$0xff] %v860_v27  ;;  %956 = vst [vmem:[#allocation7 + $0x140] sm:$0xff] %v892_v28  ;;  %v861_v33 = vmax.f32 %v633_v29, 0.0  ;;  %v893_v34 = vmax.f32 %v761_v30, 0.0 }
 0x162   :  { %925 = vst [vmem:[#allocation7 + $0x48] sm:$0xff] %v861_v33  ;;  %957 = vst [vmem:[#allocation7 + $0x148] sm:$0xff] %v893_v34 }
 0x163   :  { %v637_v35 = vpop.f32.mrb[20].mxu0  ;;  %v765_v36 = vpop.f32.mrb[20].mxu1 }
 0x164   :  { %v638_v37 = vadd.f32 %v1393_v17, %v637_v35  ;;  %v766_v38 = vadd.f32 %v1393_v17, %v765_v36  ;;  %v639_v39 = vpop.f32.mrb[21].mxu0  ;;  %v767_v40 = vpop.f32.mrb[21].mxu1 }
 0x165   :  { %v640_v41 = vpop.f32.mrb[22].mxu0  ;;  %v768_v42 = vpop.f32.mrb[22].mxu1 }
 0x166   :  { %v862_v43 = vmax.f32 %v638_v37, 0.0  ;;  %v894_v44 = vmax.f32 %v766_v38, 0.0  ;;  %v641_v45 = vadd.f32 %v1393_v17, %v640_v41  ;;  %v769_v46 = vadd.f32 %v1393_v17, %v768_v42  ;;  %v642_v47 = vpop.f32.mrb[23].mxu0  ;;  %v770_v48 = vpop.f32.mrb[23].mxu1 }
 0x168   :  { %926 = vst [vmem:[#allocation7 + $0x50] sm:$0xff] %v862_v43  ;;  %958 = vst [vmem:[#allocation7 + $0x150] sm:$0xff] %v894_v44  ;;  %v863_v49 = vmax.f32 %v641_v45, 0.0  ;;  %v895_v50 = vmax.f32 %v769_v46, 0.0 }
 0x16a   :  { %927 = vst [vmem:[#allocation7 + $0x58] sm:$0xff] %v863_v49  ;;  %959 = vst [vmem:[#allocation7 + $0x158] sm:$0xff] %v895_v50 }
 0x16b   :  { %v645_v51 = vpop.f32.mrb[24].mxu0  ;;  %v773_v52 = vpop.f32.mrb[24].mxu1 }
 0x16c   :  { %v646_v53 = vadd.f32 %v1393_v17, %v645_v51  ;;  %v774_v54 = vadd.f32 %v1393_v17, %v773_v52  ;;  %v647_v55 = vpop.f32.mrb[25].mxu0  ;;  %v775_v56 = vpop.f32.mrb[25].mxu1 }
 0x16d   :  { %v648_v57 = vpop.f32.mrb[26].mxu0  ;;  %v776_v58 = vpop.f32.mrb[26].mxu1 }
 0x16e   :  { %v864_v59 = vmax.f32 %v646_v53, 0.0  ;;  %v896_v60 = vmax.f32 %v774_v54, 0.0  ;;  %v649_v61 = vadd.f32 %v1393_v17, %v648_v57  ;;  %v777_v62 = vadd.f32 %v1393_v17, %v776_v58  ;;  %v650_v63 = vpop.f32.mrb[27].mxu0  ;;  %v778_v0 = vpop.f32.mrb[27].mxu1 }
 0x170   :  { %928 = vst [vmem:[#allocation7 + $0x60] sm:$0xff] %v864_v59  ;;  %960 = vst [vmem:[#allocation7 + $0x160] sm:$0xff] %v896_v60  ;;  %v865_v1 = vmax.f32 %v649_v61, 0.0  ;;  %v897_v2 = vmax.f32 %v777_v62, 0.0 }
 0x172   :  { %929 = vst [vmem:[#allocation7 + $0x68] sm:$0xff] %v865_v1  ;;  %961 = vst [vmem:[#allocation7 + $0x168] sm:$0xff] %v897_v2 }
 0x173   :  { %v653_v3 = vpop.f32.mrb[28].mxu0  ;;  %v781_v4 = vpop.f32.mrb[28].mxu1 }
 0x174   :  { %v654_v5 = vadd.f32 %v1393_v17, %v653_v3  ;;  %v782_v6 = vadd.f32 %v1393_v17, %v781_v4  ;;  %v655_v7 = vpop.f32.mrb[29].mxu0  ;;  %v783_v8 = vpop.f32.mrb[29].mxu1 }
 0x175   :  { %v656_v9 = vpop.f32.mrb[30].mxu0  ;;  %v784_v10 = vpop.f32.mrb[30].mxu1 }
 0x176   :  { %v866_v11 = vmax.f32 %v654_v5, 0.0  ;;  %v898_v12 = vmax.f32 %v782_v6, 0.0  ;;  %v657_v13 = vadd.f32 %v1393_v17, %v656_v9  ;;  %v785_v14 = vadd.f32 %v1393_v17, %v784_v10  ;;  %v658_v15 = vpop.f32.mrb[31].mxu0  ;;  %v786_v16 = vpop.f32.mrb[31].mxu1 }
 0x178   :  { %930 = vst [vmem:[#allocation7 + $0x70] sm:$0xff] %v866_v11  ;;  %962 = vst [vmem:[#allocation7 + $0x170] sm:$0xff] %v898_v12  ;;  %v867_v18 = vmax.f32 %v657_v13, 0.0  ;;  %v899_v19 = vmax.f32 %v785_v14, 0.0 }
 0x17a   :  { %931 = vst [vmem:[#allocation7 + $0x78] sm:$0xff] %v867_v18  ;;  %963 = vst [vmem:[#allocation7 + $0x178] sm:$0xff] %v899_v19 }
 0x17b   :  { %v661_v20 = vpop.f32.mrb[32].mxu0  ;;  %v789_v21 = vpop.f32.mrb[32].mxu1 }
 0x17c   :  { %v662_v22 = vadd.f32 %v1393_v17, %v661_v20  ;;  %v790_v23 = vadd.f32 %v1393_v17, %v789_v21  ;;  %v663_v24 = vpop.f32.mrb[33].mxu0  ;;  %v791_v25 = vpop.f32.mrb[33].mxu1 }
 0x17d   :  { %v664_v26 = vpop.f32.mrb[34].mxu0  ;;  %v792_v27 = vpop.f32.mrb[34].mxu1 }
 0x17e   :  { %v868_v28 = vmax.f32 %v662_v22, 0.0  ;;  %v900_v29 = vmax.f32 %v790_v23, 0.0  ;;  %v665_v30 = vadd.f32 %v1393_v17, %v664_v26  ;;  %v793_v31 = vadd.f32 %v1393_v17, %v792_v27  ;;  %v666_v32 = vpop.f32.mrb[35].mxu0  ;;  %v794_v33 = vpop.f32.mrb[35].mxu1 }
 0x180   :  { %932 = vst [vmem:[#allocation7 + $0x80] sm:$0xff] %v868_v28  ;;  %964 = vst [vmem:[#allocation7 + $0x180] sm:$0xff] %v900_v29  ;;  %v869_v34 = vmax.f32 %v665_v30, 0.0  ;;  %v901_v35 = vmax.f32 %v793_v31, 0.0 }
 0x182   :  { %933 = vst [vmem:[#allocation7 + $0x88] sm:$0xff] %v869_v34  ;;  %965 = vst [vmem:[#allocation7 + $0x188] sm:$0xff] %v901_v35 }
 0x183   :  { %v669_v36 = vpop.f32.mrb[36].mxu0  ;;  %v797_v37 = vpop.f32.mrb[36].mxu1 }
 0x184   :  { %v670_v38 = vadd.f32 %v1393_v17, %v669_v36  ;;  %v798_v39 = vadd.f32 %v1393_v17, %v797_v37  ;;  %v671_v40 = vpop.f32.mrb[37].mxu0  ;;  %v799_v41 = vpop.f32.mrb[37].mxu1 }
 0x185   :  { %v672_v42 = vpop.f32.mrb[38].mxu0  ;;  %v800_v43 = vpop.f32.mrb[38].mxu1 }
 0x186   :  { %v870_v44 = vmax.f32 %v670_v38, 0.0  ;;  %v902_v45 = vmax.f32 %v798_v39, 0.0  ;;  %v673_v46 = vadd.f32 %v1393_v17, %v672_v42  ;;  %v801_v47 = vadd.f32 %v1393_v17, %v800_v43  ;;  %v674_v48 = vpop.f32.mrb[39].mxu0  ;;  %v802_v49 = vpop.f32.mrb[39].mxu1 }
 0x188   :  { %934 = vst [vmem:[#allocation7 + $0x90] sm:$0xff] %v870_v44  ;;  %966 = vst [vmem:[#allocation7 + $0x190] sm:$0xff] %v902_v45  ;;  %v871_v50 = vmax.f32 %v673_v46, 0.0  ;;  %v903_v51 = vmax.f32 %v801_v47, 0.0 }
 0x18a   :  { %935 = vst [vmem:[#allocation7 + $0x98] sm:$0xff] %v871_v50  ;;  %967 = vst [vmem:[#allocation7 + $0x198] sm:$0xff] %v903_v51 }
 0x18b   :  { %v677_v52 = vpop.f32.mrb[40].mxu0  ;;  %v805_v53 = vpop.f32.mrb[40].mxu1 }
 0x18c   :  { %v678_v54 = vadd.f32 %v1393_v17, %v677_v52  ;;  %v806_v55 = vadd.f32 %v1393_v17, %v805_v53  ;;  %v679_v56 = vpop.f32.mrb[41].mxu0  ;;  %v807_v57 = vpop.f32.mrb[41].mxu1 }
 0x18d   :  { %v680_v58 = vpop.f32.mrb[42].mxu0  ;;  %v808_v59 = vpop.f32.mrb[42].mxu1 }
 0x18e   :  { %v872_v60 = vmax.f32 %v678_v54, 0.0  ;;  %v904_v61 = vmax.f32 %v806_v55, 0.0  ;;  %v681_v62 = vadd.f32 %v1393_v17, %v680_v58  ;;  %v809_v63 = vadd.f32 %v1393_v17, %v808_v59  ;;  %v682_v0 = vpop.f32.mrb[43].mxu0  ;;  %v810_v1 = vpop.f32.mrb[43].mxu1 }
 0x190   :  { %936 = vst [vmem:[#allocation7 + $0xa0] sm:$0xff] %v872_v60  ;;  %968 = vst [vmem:[#allocation7 + $0x1a0] sm:$0xff] %v904_v61  ;;  %v873_v2 = vmax.f32 %v681_v62, 0.0  ;;  %v905_v3 = vmax.f32 %v809_v63, 0.0 }
 0x192   :  { %937 = vst [vmem:[#allocation7 + $0xa8] sm:$0xff] %v873_v2  ;;  %969 = vst [vmem:[#allocation7 + $0x1a8] sm:$0xff] %v905_v3 }
 0x193   :  { %v685_v4 = vpop.f32.mrb[44].mxu0  ;;  %v813_v5 = vpop.f32.mrb[44].mxu1 }
 0x194   :  { %v686_v6 = vadd.f32 %v1393_v17, %v685_v4  ;;  %v814_v7 = vadd.f32 %v1393_v17, %v813_v5  ;;  %v687_v8 = vpop.f32.mrb[45].mxu0  ;;  %v815_v9 = vpop.f32.mrb[45].mxu1 }
 0x195   :  { %v688_v10 = vpop.f32.mrb[46].mxu0  ;;  %v816_v11 = vpop.f32.mrb[46].mxu1 }
 0x196   :  { %v874_v12 = vmax.f32 %v686_v6, 0.0  ;;  %v906_v13 = vmax.f32 %v814_v7, 0.0  ;;  %v689_v14 = vadd.f32 %v1393_v17, %v688_v10  ;;  %v817_v15 = vadd.f32 %v1393_v17, %v816_v11  ;;  %v690_v16 = vpop.f32.mrb[47].mxu0  ;;  %v818_v18 = vpop.f32.mrb[47].mxu1 }
 0x198   :  { %938 = vst [vmem:[#allocation7 + $0xb0] sm:$0xff] %v874_v12  ;;  %970 = vst [vmem:[#allocation7 + $0x1b0] sm:$0xff] %v906_v13  ;;  %v875_v19 = vmax.f32 %v689_v14, 0.0  ;;  %v907_v20 = vmax.f32 %v817_v15, 0.0 }
 0x19a   :  { %939 = vst [vmem:[#allocation7 + $0xb8] sm:$0xff] %v875_v19  ;;  %971 = vst [vmem:[#allocation7 + $0x1b8] sm:$0xff] %v907_v20 }
 0x19b   :  { %v693_v21 = vpop.f32.mrb[48].mxu0  ;;  %v821_v22 = vpop.f32.mrb[48].mxu1 }
 0x19c   :  { %v694_v23 = vadd.f32 %v1393_v17, %v693_v21  ;;  %v822_v24 = vadd.f32 %v1393_v17, %v821_v22  ;;  %v695_v25 = vpop.f32.mrb[49].mxu0  ;;  %v823_v26 = vpop.f32.mrb[49].mxu1 }
 0x19d   :  { %v696_v27 = vpop.f32.mrb[50].mxu0  ;;  %v824_v28 = vpop.f32.mrb[50].mxu1 }
 0x19e   :  { %v876_v29 = vmax.f32 %v694_v23, 0.0  ;;  %v908_v30 = vmax.f32 %v822_v24, 0.0  ;;  %v697_v31 = vadd.f32 %v1393_v17, %v696_v27  ;;  %v825_v32 = vadd.f32 %v1393_v17, %v824_v28  ;;  %v698_v33 = vpop.f32.mrb[51].mxu0  ;;  %v826_v34 = vpop.f32.mrb[51].mxu1 }
 0x1a0   :  { %940 = vst [vmem:[#allocation7 + $0xc0] sm:$0xff] %v876_v29  ;;  %972 = vst [vmem:[#allocation7 + $0x1c0] sm:$0xff] %v908_v30  ;;  %v877_v35 = vmax.f32 %v697_v31, 0.0  ;;  %v909_v36 = vmax.f32 %v825_v32, 0.0 }
 0x1a2   :  { %941 = vst [vmem:[#allocation7 + $0xc8] sm:$0xff] %v877_v35  ;;  %973 = vst [vmem:[#allocation7 + $0x1c8] sm:$0xff] %v909_v36 }
 0x1a3   :  { %v701_v37 = vpop.f32.mrb[52].mxu0  ;;  %v829_v38 = vpop.f32.mrb[52].mxu1 }
 0x1a4   :  { %v702_v39 = vadd.f32 %v1393_v17, %v701_v37  ;;  %v830_v40 = vadd.f32 %v1393_v17, %v829_v38  ;;  %v703_v41 = vpop.f32.mrb[53].mxu0  ;;  %v831_v42 = vpop.f32.mrb[53].mxu1 }
 0x1a5   :  { %v704_v43 = vpop.f32.mrb[54].mxu0  ;;  %v832_v44 = vpop.f32.mrb[54].mxu1 }
 0x1a6   :  { %v878_v45 = vmax.f32 %v702_v39, 0.0  ;;  %v910_v46 = vmax.f32 %v830_v40, 0.0  ;;  %v705_v47 = vadd.f32 %v1393_v17, %v704_v43  ;;  %v833_v48 = vadd.f32 %v1393_v17, %v832_v44  ;;  %v706_v49 = vpop.f32.mrb[55].mxu0  ;;  %v834_v50 = vpop.f32.mrb[55].mxu1 }
 0x1a8   :  { %942 = vst [vmem:[#allocation7 + $0xd0] sm:$0xff] %v878_v45  ;;  %974 = vst [vmem:[#allocation7 + $0x1d0] sm:$0xff] %v910_v46  ;;  %v879_v51 = vmax.f32 %v705_v47, 0.0  ;;  %v911_v52 = vmax.f32 %v833_v48, 0.0 }
 0x1aa   :  { %943 = vst [vmem:[#allocation7 + $0xd8] sm:$0xff] %v879_v51  ;;  %975 = vst [vmem:[#allocation7 + $0x1d8] sm:$0xff] %v911_v52 }
 0x1ab   :  { %v709_v53 = vpop.f32.mrb[56].mxu0  ;;  %v837_v54 = vpop.f32.mrb[56].mxu1 }
 0x1ac   :  { %v710_v55 = vadd.f32 %v1393_v17, %v709_v53  ;;  %v838_v56 = vadd.f32 %v1393_v17, %v837_v54  ;;  %v711_v57 = vpop.f32.mrb[57].mxu0  ;;  %v839_v58 = vpop.f32.mrb[57].mxu1 }
 0x1ad   :  { %v712_v59 = vpop.f32.mrb[58].mxu0  ;;  %v840_v60 = vpop.f32.mrb[58].mxu1 }
 0x1ae   :  { %v880_v61 = vmax.f32 %v710_v55, 0.0  ;;  %v912_v62 = vmax.f32 %v838_v56, 0.0  ;;  %v713_v63 = vadd.f32 %v1393_v17, %v712_v59  ;;  %v841_v0 = vadd.f32 %v1393_v17, %v840_v60  ;;  %v714_v1 = vpop.f32.mrb[59].mxu0  ;;  %v842_v2 = vpop.f32.mrb[59].mxu1 }
 0x1b0   :  { %944 = vst [vmem:[#allocation7 + $0xe0] sm:$0xff] %v880_v61  ;;  %976 = vst [vmem:[#allocation7 + $0x1e0] sm:$0xff] %v912_v62  ;;  %v881_v3 = vmax.f32 %v713_v63, 0.0  ;;  %v913_v4 = vmax.f32 %v841_v0, 0.0 }
 0x1b2   :  { %945 = vst [vmem:[#allocation7 + $0xe8] sm:$0xff] %v881_v3  ;;  %977 = vst [vmem:[#allocation7 + $0x1e8] sm:$0xff] %v913_v4 }
 0x1b3   :  { %v717_v5 = vpop.f32.mrb[60].mxu0  ;;  %v845_v6 = vpop.f32.mrb[60].mxu1 }
 0x1b4   :  { %v718_v7 = vadd.f32 %v1393_v17, %v717_v5  ;;  %v846_v8 = vadd.f32 %v1393_v17, %v845_v6  ;;  %v719_v9 = vpop.f32.mrb[61].mxu0  ;;  %v847_v10 = vpop.f32.mrb[61].mxu1 }
 0x1b5   :  { %v720_v11 = vpop.f32.mrb[62].mxu0  ;;  %v848_v12 = vpop.f32.mrb[62].mxu1 }
 0x1b6   :  { %v882_v13 = vmax.f32 %v718_v7, 0.0  ;;  %v914_v14 = vmax.f32 %v846_v8, 0.0  ;;  %v721_v15 = vadd.f32 %v1393_v17, %v720_v11  ;;  %v849_v16 = vadd.f32 %v1393_v17, %v848_v12  ;;  %v722_v18 = vpop.f32.mrb[63].mxu0  ;;  %v850_v19 = vpop.f32.mrb[63].mxu1 }
 0x1b8   :  { %946 = vst [vmem:[#allocation7 + $0xf0] sm:$0xff] %v882_v13  ;;  %978 = vst [vmem:[#allocation7 + $0x1f0] sm:$0xff] %v914_v14  ;;  %v883_v20 = vmax.f32 %v721_v15, 0.0  ;;  %v915_v21 = vmax.f32 %v849_v16, 0.0 }
 0x1ba   :  { %947 = vst [vmem:[#allocation7 + $0xf8] sm:$0xff] %v883_v20  ;;  %979 = vst [vmem:[#allocation7 + $0x1f8] sm:$0xff] %v915_v21 }
 0x1bb   :  { %1286 = shalt.err (!%p1283_p6)
}
 0x1bc   :  { %s1287_s17 = scalar_lea.hbm %s1477_s3, 8192 }
 0x1bd   :  { %p1288_p7 = scmp.ne.s32.totalorder %s1477_s3, %s1287_s17  ;;  %p1291_p8 = scmp.lt.u32.totalorder %s1287_s17, %s1477_s3 }
 0x1bf   :  { %p1293_p9 = pnand %p1291_p8, %p1288_p7 }
 0x1c1   :  { %1296 = shalt.err (!%p1293_p9)
}
 0x1c2   :  { %991 = dma.vmem_to_hbm [thread:$0]  %s986_s13, 8192, %s1477_s3, [#allocation4], %s1304_s22, %s1304_s22, %s1305_s23  }
 0x1c3   :  { %1301 = dma.done.wait [#allocation4], 8192  }
 0x1c4   :  { %1302 = vsyncadd [#allocation4], 4294959104 }
 0x1c5   :  { %995 = vsyncpa [#allocation3], 1 }
 0x1c6   :  { %996 = vsyncpa [#allocation6], 1 }
 0x1c7   :  { %997 = vsyncpa [#allocation4], 1 }

</bundles_post_ra>
